<compile_context>
chip_gen: v7x
topology: tpu7x:2x2x1
jax: 0.10.0
libtpu: 0.0.40
codegen_flags: <defaults>
</compile_context>

<pallas_src>
import functools

import jax
import jax.numpy as jnp
from jax.experimental import pallas as pl
from jax.experimental.pallas import tpu as pltpu


# Conv taps in (dy, dx) order; tap index t = (dy+1)*3 + (dx+1) = ky*3 + kx.
_TAPS = tuple((dy, dx) for dy in (-1, 0, 1) for dx in (-1, 0, 1))

_ROLL_LIKE_NUMPY = None


def _roll_matches_numpy():
    """Cached one-off probe of pltpu.roll's rotation direction.

    The conv-tap shifts depend on the sign convention; this compiles one tiny
    kernel at most once per process (robustness guard, review item: cached).
    """
    global _ROLL_LIKE_NUMPY
    if _ROLL_LIKE_NUMPY is None:
        def k(x_ref, o_ref):
            o_ref[...] = pltpu.roll(x_ref[...], 1, axis=1)

        x = jnp.arange(8 * 128, dtype=jnp.float32).reshape(8, 128)
        out = pl.pallas_call(
            k, out_shape=jax.ShapeDtypeStruct((8, 128), jnp.float32))(x)
        _ROLL_LIKE_NUMPY = bool(jnp.array_equal(out, jnp.roll(x, 1, axis=1)))
    return _ROLL_LIKE_NUMPY


def _pack_w(w_oihw):
    """OIHW conv weight -> (Cout, 9*Cin) tap-major matmul weight."""
    o, i, kh, kw = w_oihw.shape
    return jnp.transpose(w_oihw, (0, 2, 3, 1)).reshape(o, kh * kw * i)


def _boundary_masks(H, W, images_per_block):
    """(8, images_per_block*H*W) f32 validity mask per non-center tap."""
    lane = jnp.arange(H * W, dtype=jnp.int32)
    hh = lane // W
    ww = lane % W
    rows = []
    for dy, dx in _TAPS:
        if dy == 0 and dx == 0:
            continue
        valid = ((hh + dy >= 0) & (hh + dy < H) &
                 (ww + dx >= 0) & (ww + dx < W))
        rows.append(valid)
    m = jnp.stack(rows).astype(jnp.float32)            # (8, H*W)
    return jnp.tile(m, (1, images_per_block))          # (8, Bt*H*W)


def _fusion_mask_kernel(fea_ref, msk_ref, w0_ref, w1_ref, w2_ref, b_ref,
                        alpha_ref, o_ref, col_ref, *, W, roll_like_numpy):
    """One lane slab of the fused conv/PReLU/conv/PReLU/conv/sigmoid chain."""
    lanes = fea_ref.shape[1]
    cin0 = fea_ref.shape[0]          # 2 * features (conv0 input channels)
    cin1 = o_ref.shape[0]            # features     (conv1/conv2 input channels)

    def conv3x3(x, w_bf16, bias, cin):
        # Build the (9*cin, lanes) im2col operand straight into the shared
        # VMEM scratch via 9 aligned slice stores; tap t occupies rows
        # [t*cin, (t+1)*cin).  Shifts are XLU lane rotations; boundary (and
        # cross-image) lanes are killed by the precomputed broadcast masks.
        mi = 0
        for t, (dy, dx) in enumerate(_TAPS):
            d = dy * W + dx
            if d == 0:
                col_ref[pl.ds(t * cin, cin), :] = x
            else:
                shift = (-d) % lanes if roll_like_numpy else d % lanes
                shifted = pltpu.roll(x, shift, axis=1)
                col_ref[pl.ds(t * cin, cin), :] = (
                    shifted * msk_ref[pl.ds(mi, 1), :])
                mi += 1
        # Single K = 9*cin MXU contraction: bf16 operands, f32 accumulation.
        col = col_ref[pl.ds(0, 9 * cin), :].astype(jnp.bfloat16)
        return jnp.dot(w_bf16, col, preferred_element_type=jnp.float32) + bias

    x = fea_ref[...]                                     # (2C, lanes) f32

    y = conv3x3(x, w0_ref[...], b_ref[0], cin0)          # conv0
    a0 = alpha_ref[0]
    y = jnp.where(y >= 0.0, y, a0 * y)                   # PReLU0

    y = conv3x3(y, w1_ref[...], b_ref[1], cin1)          # conv1
    a1 = alpha_ref[1]
    y = jnp.where(y >= 0.0, y, a1 * y)                   # PReLU1

    y = conv3x3(y, w2_ref[...], b_ref[2], cin1)          # conv2
    o_ref[...] = jax.nn.sigmoid(y).astype(o_ref.dtype)   # Sigmoid


@functools.partial(jax.jit, static_argnames=("lane_blocks", "roll_like_numpy"))
def _fusion_mask_impl(ref, key, params, *, lane_blocks, roll_like_numpy):
    B, C, H, W = ref.shape
    HW = H * W
    assert B % lane_blocks == 0, "lane_blocks must divide the batch"
    bt = B // lane_blocks                       # images per grid step
    lb = bt * HW                                # lane extent per grid step
    assert lb % 128 == 0, "pad H*W (or pick lane_blocks) so blocks stay lane-dense"

    # Channel concat + channels-major flatten, once, in XLA (not in the kernel).
    fea = jnp.concatenate([ref, key], axis=1)                  # (B, 2C, H, W)
    fea = jnp.transpose(fea, (1, 0, 2, 3)).reshape(2 * C, B * HW)
    fea = fea.astype(jnp.float32)

    masks = _boundary_masks(H, W, bt)                          # (8, lb) f32

    # bf16 MXU weights (f32 accumulation happens in-kernel); packed biases.
    w0 = _pack_w(params["w0"]).astype(jnp.bfloat16)            # (C, 9*2C)
    w1 = _pack_w(params["w1"]).astype(jnp.bfloat16)            # (C, 9*C)
    w2 = _pack_w(params["w2"]).astype(jnp.bfloat16)            # (C, 9*C)
    biases = jnp.stack([params["b0"], params["b1"], params["b2"]]
                       ).astype(jnp.float32).reshape(3, C, 1)
    alphas = jnp.stack([params["a0"], params["a1"]]).astype(jnp.float32)

    kernel = functools.partial(_fusion_mask_kernel, W=W,
                               roll_like_numpy=roll_like_numpy)

    def resident(shape):                 # same block every grid step
        return pl.BlockSpec(shape, lambda i, _n=len(shape): (0,) * _n)

    out = pl.pallas_call(
        kernel,
        out_shape=jax.ShapeDtypeStruct((C, B * HW), jnp.float32),
        grid=(lane_blocks,),
        in_specs=[
            pl.BlockSpec((2 * C, lb), lambda i: (0, i)),       # input slab
            resident(masks.shape),                             # boundary masks
            resident(w0.shape), resident(w1.shape), resident(w2.shape),
            resident(biases.shape),                            # packed biases
            pl.BlockSpec(memory_space=pltpu.MemorySpace.SMEM), # PReLU alphas
        ],
        out_specs=pl.BlockSpec((C, lb), lambda i: (0, i)),
        scratch_shapes=[pltpu.VMEM((9 * 2 * C, lb), jnp.float32)],  # im2col
        compiler_params=pltpu.CompilerParams(
            dimension_semantics=("parallel",),   # v7x: lane slabs across 2 TCs
            vmem_limit_bytes=32 * 1024 * 1024),
    )(fea, masks, w0, w1, w2, biases, alphas)

    out = out.reshape(C, B, H, W)
    return jnp.transpose(out, (1, 0, 2, 3)).astype(ref.dtype)


def fusion_mask_v1(ref, key, params, *, lane_blocks=1):
    """ref, key: NCHW float32.  Returns the fusion mask in NCHW.

    lane_blocks: number of grid steps the folded (images-on-lanes) slab is
    split into.  1 is right for single-TensorCore chips at small sizes; use 2
    on v7x so each core gets one substantial slab.
    """
    return _fusion_mask_impl(ref, key, params, lane_blocks=lane_blocks,
                             roll_like_numpy=_roll_matches_numpy())


def init_params(features, key):
    """Deterministic parameter init matching the PyTorch module's shapes."""
    k0, k1, k2, kb0, kb1, kb2 = jax.random.split(key, 6)
    f = features
    return {
        "w0": jax.random.normal(k0, (f, 2 * f, 3, 3), jnp.float32) * 0.05,
        "b0": jax.random.normal(kb0, (f,), jnp.float32) * 0.01,
        "w1": jax.random.normal(k1, (f, f, 3, 3), jnp.float32) * 0.05,
        "b1": jax.random.normal(kb1, (f,), jnp.float32) * 0.01,
        "w2": jax.random.normal(k2, (f, f, 3, 3), jnp.float32) * 0.05,
        "b2": jax.random.normal(kb2, (f,), jnp.float32) * 0.01,
        "a0": jnp.float32(0.25),   # nn.PReLU default init
        "a1": jnp.float32(0.25),
    }


def _reference_forward(ref, key, params):
    """Pure-JAX f32 reference (lax.conv) used for the correctness check."""
    def conv(x, w, b):
        y = jax.lax.conv_general_dilated(
            x, w, window_strides=(1, 1), padding="SAME",
            dimension_numbers=("NCHW", "OIHW", "NCHW"))
        return y + b[None, :, None, None]

    def prelu(x, a):
        return jnp.where(x >= 0.0, x, a * x)

    fea = jnp.concatenate([ref, key], axis=1)
    x = prelu(conv(fea, params["w0"], params["b0"]), params["a0"])
    x = prelu(conv(x, params["w1"], params["b1"]), params["a1"])
    x = conv(x, params["w2"], params["b2"])
    return jax.nn.sigmoid(x)


if __name__ == "__main__":
    features = 8
    B, H, W = 2, 16, 16

    root = jax.random.PRNGKey(0)
    kp, kr, kk = jax.random.split(root, 3)

    params = init_params(features, kp)
    ref = jax.random.normal(kr, (B, features, H, W), jnp.float32)
    key = jax.random.normal(kk, (B, features, H, W), jnp.float32)

    mask = fusion_mask_v1(ref, key, params)
    mask = jax.block_until_ready(mask)

    # Parity vs. the f32 lax.conv reference; tolerance re-baselined for the
    # bf16 MXU operands (f32 accumulation), per the perf review.
    mask_ref = _reference_forward(ref, key, params)
    assert mask.shape == (B, features, H, W)
    err = float(jnp.max(jnp.abs(mask - mask_ref)))
    assert err < 2e-2, err

    print("KERNEL_OK")
</pallas_src>

<mosaic_0001>
module attributes {stable_mosaic.version = 11 : i64} {
  func.func @k(%arg0: memref<8x128xf32, #tpu.memory_space<vmem>>, %arg1: memref<8x128xf32, #tpu.memory_space<vmem>>) attributes {dimension_semantics = [], scalar_prefetch = 0 : i64, scratch_operands = 0 : i64, tpu.core_type = #tpu.core_type<tc>} {
    %c0 = arith.constant 0 : index
    %c0_0 = arith.constant 0 : index
    %0 = vector.load %arg0[%c0, %c0_0] : memref<8x128xf32, #tpu.memory_space<vmem>>, vector<8x128xf32>
    %c1_i32 = arith.constant 1 : i32
    %1 = tpu.dynamic_rotate %0 by %c1_i32 dim 1 : vector<8x128xf32>, i32 -> vector<8x128xf32>
    %c0_1 = arith.constant 0 : index
    %c0_2 = arith.constant 0 : index
    %2 = vector.load %arg1[%c0_1, %c0_2] : memref<8x128xf32, #tpu.memory_space<vmem>>, vector<8x128xf32>
    tpu.vector_store %arg1[%c0_1, %c0_2], %1 {strides = array<i32>} : memref<8x128xf32, #tpu.memory_space<vmem>>, vector<8x128xf32>,
    return
  }
}

</mosaic_0001>

<bundles_post_ra>
// kernel: tpu_custom_call.1
= control target key start
LH: loop header
LB: loop body
LE: loop exit
PB: predicated region body
PF: predicated region fallthrough
CT: control target
= control target key end

     0   :  { %6 = vsyncpa [#allocation3], 0  ;;  %s128_s0 = inlined_call_operand.hbm [shape: f32[8,128], index: 0, kind: input, shape index: {}]   ;;  %s129_s1 = inlined_call_operand.hbm [shape: f32[8,128], index: 1, kind: output, shape index: {}]  }
   0x1   :  { %7 = vsyncpa [#allocation4], 0  ;;  %s91_s6 = smov [#allocation2]   ;;  %s43_s10 = scalar_lea.hbm %s128_s0, 128 }
   0x2   :  { %s14_s7 = sshll.u32 %s91_s6, 4  ;;  %p44_p0 = scmp.ne.s32.totalorder %s128_s0, %s43_s10  ;;  %s15_s7 = int_to_ptr.vmem [resolvable:$true] %s14_s7 }
   0x3   :  { %p47_p1 = scmp.lt.u32.totalorder %s43_s10, %s128_s0 }
   0x5   :  { %p49_p2 = pnand %p47_p1, %p44_p0 }
   0x7   :  { %52 = shalt.err (!%p49_p2)
}
   0x8   :  { %s53_s15 = scalar_lea.vmem %s15_s7, 128  ;;  %p58_p4 = scmp.lt.s32.totalorder %s15_s7, %s15_s7 }
   0x9   :  { %p54_p3 = scmp.ne.s32.totalorder %s15_s7, %s53_s15  ;;  %p59_p5 = scmp.lt.s32.totalorder %s53_s15, %s53_s15 }
   0xb   :  { %p60_p6 = por %p59_p5, %p58_p4 }
   0xd   :  { %p61_p7 = pnand %p60_p6, %p54_p3 }
   0xf   :  { %64 = shalt.err (!%p61_p7)
}
  0x10   :  { %17 = dma.hbm_to_vmem [thread:$0]  %s128_s0, 128, %s15_s7, [#allocation3]  }
  0x11   :  { %87 = dma.done.wait [#allocation3], 128  }
  0x12   :  { %88 = vsyncadd [#allocation3], 4294967168  ;;  %v21_v0 = vld [vmem:[#allocation2] sm:$0xff]  ;;  %s92_s18 = smov 1   ;;  %s93_s19 = smov [#allocation5]  }
  0x13   :  { %22 = vrot.lane.b32.xlu0 %v21_v0, %s92_s18  ;;  %s31_s20 = sshll.u32 %s93_s19, 4  ;;  %s32_s20 = int_to_ptr.vmem [resolvable:$true] %s31_s20 }
  0x14   :  { %s65_s21 = scalar_lea.vmem %s32_s20, 128  ;;  %p70_p9 = scmp.lt.s32.totalorder %s32_s20, %s32_s20 }
  0x15   :  { %p66_p8 = scmp.ne.s32.totalorder %s32_s20, %s65_s21  ;;  %p71_p10 = scmp.lt.s32.totalorder %s65_s21, %s65_s21 }
  0x17   :  { %p72_p11 = por %p71_p10, %p70_p9 }
  0x19   :  { %p73_p12 = pnand %p72_p11, %p66_p8 }
  0x85   :  { %v23_v1 = vpop.permute.xlu0 %22 }
  0x86   :  { %24 = vst [vmem:[#allocation5] sm:$0xff] %v23_v1 }
  0x87   :  { %76 = shalt.err (!%p73_p12)
}
  0x88   :  { %s77_s0 = scalar_lea.hbm %s129_s1, 128 }
  0x89   :  { %p78_p13 = scmp.ne.s32.totalorder %s129_s1, %s77_s0  ;;  %p81_p0 = scmp.lt.u32.totalorder %s77_s0, %s129_s1 }
  0x8b   :  { %p83_p1 = pnand %p81_p0, %p78_p13 }
  0x8d   :  { %86 = shalt.err (!%p83_p1)
}
  0x8e   :  { %34 = dma.vmem_to_hbm [thread:$0]  %s32_s20, 128, %s129_s1, [#allocation4]  }
  0x8f   :  { %89 = dma.done.wait [#allocation4], 128  }
  0x90   :  { %90 = vsyncadd [#allocation4], 4294967168 }
  0x91   :  { %38 = vsyncpa [#allocation3], 1 }
  0x92   :  { %39 = vsyncpa [#allocation4], 1 }

</bundles_post_ra>
